<compile_context>
chip_gen: v7x
topology: tpu7x:2x2x1
jax: 0.10.0
libtpu: 0.0.40
codegen_flags: <defaults>
</compile_context>

<pallas_src>
import math
from functools import partial

import jax
import jax.numpy as jnp
from jax import lax
from jax.experimental import pallas as pl
from jax.experimental.pallas import tpu as pltpu


# ------------------------------ fused kernel --------------------------------

def _fused_encdec_kernel(B, Ts, Tt, D, V,
                         hsrc_ref, htar_ref,
                         enc_w_ref, enc_b_ref,
                         wq_ref, wk_ref, wv_ref, wo_ref, bo_ref,
                         fp_w_ref, fp_b_ref,
                         out_ref):
    """Fully fused forward.

    hsrc_ref: [B*Ts, D]  sqrt(d_model)-scaled source embeddings (flattened rows)
    htar_ref: [B*Tt, D]  sqrt(d_model)-scaled target embeddings (flattened rows)
    out_ref : [B*Tt, V]  logits
    """
    f32 = jnp.float32

    # ---- encoder: relu(x @ W + b) over ALL batches' rows in one MXU matmul
    enc = jnp.dot(hsrc_ref[...], enc_w_ref[...], preferred_element_type=f32)
    enc = jnp.maximum(enc + enc_b_ref[...], 0.0)                          # [B*Ts, D]

    # ---- Q/K/V projections hoisted out of the per-batch attention (batched rows)
    q = jnp.dot(htar_ref[...], wq_ref[...], preferred_element_type=f32)   # [B*Tt, D]
    k = jnp.dot(enc,           wk_ref[...], preferred_element_type=f32)   # [B*Ts, D]
    v = jnp.dot(enc,           wv_ref[...], preferred_element_type=f32)   # [B*Ts, D]

    q3 = q.reshape(B, Tt, D)   # sublane-aligned split of the row dim (16 -> 2x8)
    k3 = k.reshape(B, Ts, D)
    v3 = v.reshape(B, Ts, D)

    # ---- scores: contract feature dims directly, no explicit k transpose
    scale = 1.0 / math.sqrt(float(D))
    s = lax.dot_general(q3, k3, (((2,), (2,)), ((0,), (0,))),
                        preferred_element_type=f32) * scale               # [B, Tt, Ts]

    # ---- softmax (max-subtracted; EUP approx reciprocal for the denominator)
    s = s - jnp.max(s, axis=-1, keepdims=True)
    p = jnp.exp(s)
    p = p * pl.reciprocal(jnp.sum(p, axis=-1, keepdims=True), approx=True)

    # ---- context + decoder output projection
    ctx = lax.dot_general(p, v3, (((2,), (1,)), ((0,), (0,))),
                          preferred_element_type=f32)                     # [B, Tt, D]
    dec = jnp.dot(ctx.reshape(B * Tt, D), wo_ref[...],
                  preferred_element_type=f32) + bo_ref[...]               # [B*Tt, D]

    # ---- final projection to target vocab (lane-dense V, VMEM-resident weight)
    # TODO(synk): for large tgt_vocab / d_model, split this into a separate
    # (M, N, K)-tiled pallas_call with an f32 accumulator + pl.when init/finalize
    # so the [D, V] weight streams through VMEM instead of being fully resident.
    logits = jnp.dot(dec, fp_w_ref[...], preferred_element_type=f32) + fp_b_ref[...]
    out_ref[...] = logits


def _fullblock(shape):
    # Whole-array block; with no grid the index_map takes no arguments.
    return pl.BlockSpec(shape, lambda *_: (0,) * len(shape))


def fused_encoder_decoder(h_src, h_tar, enc_w, enc_b, wq, wk, wv, wo, bo, fp_w, fp_b):
    B, Ts, D = h_src.shape
    _, Tt, _ = h_tar.shape
    V = fp_w.shape[1]
    Ms, Mt = B * Ts, B * Tt

    kernel = partial(_fused_encdec_kernel, B, Ts, Tt, D, V)
    out = pl.pallas_call(
        kernel,
        out_shape=jax.ShapeDtypeStruct((Mt, V), jnp.float32),
        in_specs=[_fullblock((Ms, D)), _fullblock((Mt, D)),
                  _fullblock((D, D)), _fullblock((1, D)),
                  _fullblock((D, D)), _fullblock((D, D)), _fullblock((D, D)),
                  _fullblock((D, D)), _fullblock((1, D)),
                  _fullblock((D, V)), _fullblock((1, V))],
        out_specs=_fullblock((Mt, V)),
        compiler_params=pltpu.CompilerParams(vmem_limit_bytes=32 * 1024 * 1024),
    )(h_src.reshape(Ms, D), h_tar.reshape(Mt, D),
      enc_w, enc_b, wq, wk, wv, wo, bo, fp_w, fp_b)
    return out.reshape(B, Tt, V)


# ----------------------------- EncoderDecoder -------------------------------

class EncoderDecoderPallas:
    def __init__(self, src_vocab, tgt_vocab, d_model, key):
        ks = jax.random.split(key, 8)
        s = 0.02
        self.d_model = d_model
        # embeddings (raw tables kept for the reference; scale pre-folded for the kernel)
        self.src_emb = (jax.random.normal(ks[0], (src_vocab, d_model)) * s).astype(jnp.float32)
        self.tar_emb = (jax.random.normal(ks[1], (tgt_vocab, d_model)) * s).astype(jnp.float32)
        self._src_emb_scaled = self.src_emb * math.sqrt(d_model)
        self._tar_emb_scaled = self.tar_emb * math.sqrt(d_model)
        # encoder (Linear + ReLU)
        self.enc_w = (jax.random.normal(ks[2], (d_model, d_model)) * s).astype(jnp.float32)
        self.enc_b = jnp.zeros((1, d_model), jnp.float32)
        # decoder (single-head cross attention)
        self.wq = (jax.random.normal(ks[3], (d_model, d_model)) * s).astype(jnp.float32)
        self.wk = (jax.random.normal(ks[4], (d_model, d_model)) * s).astype(jnp.float32)
        self.wv = (jax.random.normal(ks[5], (d_model, d_model)) * s).astype(jnp.float32)
        self.wo = (jax.random.normal(ks[6], (d_model, d_model)) * s).astype(jnp.float32)
        self.bo = jnp.zeros((1, d_model), jnp.float32)
        # final projection
        self.fp_w = (jax.random.normal(ks[7], (d_model, tgt_vocab)) * s).astype(jnp.float32)
        self.fp_b = jnp.zeros((1, tgt_vocab), jnp.float32)

    # forward(src, tar) = final_project(decoder(tar_embed(tar), encoder(src_embed(src))))
    # (encode + decode are fused into a single Pallas kernel; the embedding gathers
    #  are the only plain-JAX ops.)
    def __call__(self, src, tar):
        h_src = jnp.take(self._src_emb_scaled, src, axis=0)   # [B, Ts, D]
        h_tar = jnp.take(self._tar_emb_scaled, tar, axis=0)   # [B, Tt, D]
        return fused_encoder_decoder(h_src, h_tar,
                                     self.enc_w, self.enc_b,
                                     self.wq, self.wk, self.wv, self.wo, self.bo,
                                     self.fp_w, self.fp_b)


# ------------------------------ reference (plain JAX) ------------------------

def reference_forward(m: EncoderDecoderPallas, src, tar):
    h_src = jnp.take(m.src_emb, src, axis=0) * math.sqrt(m.d_model)
    enc = jnp.maximum(h_src @ m.enc_w + m.enc_b[0], 0.0)
    h_tar = jnp.take(m.tar_emb, tar, axis=0) * math.sqrt(m.d_model)
    q = h_tar @ m.wq
    k = enc @ m.wk
    v = enc @ m.wv
    s = jnp.einsum("btd,bsd->bts", q, k) / math.sqrt(m.d_model)
    p = jax.nn.softmax(s, axis=-1)
    ctx = jnp.einsum("bts,bsd->btd", p, v) @ m.wo + m.bo[0]
    return ctx @ m.fp_w + m.fp_b[0]


# ----------------------------------- main ------------------------------------

if __name__ == "__main__":
    # lane-dense dims: d_model and tgt_vocab are multiples of 128
    B, Ts, Tt, D = 2, 8, 8, 128
    SRC_VOCAB, TGT_VOCAB = 128, 128

    key = jax.random.PRNGKey(0)
    k_model, k_src, k_tar = jax.random.split(key, 3)

    model = EncoderDecoderPallas(SRC_VOCAB, TGT_VOCAB, D, k_model)

    src = jax.random.randint(k_src, (B, Ts), 0, SRC_VOCAB, dtype=jnp.int32)
    tar = jax.random.randint(k_tar, (B, Tt), 0, TGT_VOCAB, dtype=jnp.int32)

    out = jax.block_until_ready(model(src, tar))

    ref = reference_forward(model, src, tar)
    assert out.shape == (B, Tt, TGT_VOCAB), out.shape
    max_err = float(jnp.max(jnp.abs(out - ref)))
    assert jnp.allclose(out, ref, atol=1e-3, rtol=1e-3), f"mismatch vs JAX reference: {max_err}"

    print("KERNEL_OK")
</pallas_src>

<mosaic_0001>
module attributes {stable_mosaic.version = 11 : i64} {
  func.func @_fused_encdec_kernel(%arg0: memref<16x128xf32, #tpu.memory_space<vmem>>, %arg1: memref<16x128xf32, #tpu.memory_space<vmem>>, %arg2: memref<128x128xf32, #tpu.memory_space<vmem>>, %arg3: memref<1x128xf32, #tpu.memory_space<vmem>>, %arg4: memref<128x128xf32, #tpu.memory_space<vmem>>, %arg5: memref<128x128xf32, #tpu.memory_space<vmem>>, %arg6: memref<128x128xf32, #tpu.memory_space<vmem>>, %arg7: memref<128x128xf32, #tpu.memory_space<vmem>>, %arg8: memref<1x128xf32, #tpu.memory_space<vmem>>, %arg9: memref<128x128xf32, #tpu.memory_space<vmem>>, %arg10: memref<1x128xf32, #tpu.memory_space<vmem>>, %arg11: memref<16x128xf32, #tpu.memory_space<vmem>>) attributes {dimension_semantics = [], scalar_prefetch = 0 : i64, scratch_operands = 0 : i64, tpu.core_type = #tpu.core_type<tc>} {
    %c0 = arith.constant 0 : index
    %c0_0 = arith.constant 0 : index
    %0 = vector.load %arg0[%c0, %c0_0] : memref<16x128xf32, #tpu.memory_space<vmem>>, vector<16x128xf32>
    %c0_1 = arith.constant 0 : index
    %c0_2 = arith.constant 0 : index
    %1 = vector.load %arg2[%c0_1, %c0_2] : memref<128x128xf32, #tpu.memory_space<vmem>>, vector<128x128xf32>
    %cst = arith.constant dense<0.000000e+00> : vector<16x128xf32>
    %2 = tpu.matmul %0, %1, %cst {dimension_numbers = #tpu.dot_dimension_numbers<[1], [0], [0], [1], [0, 0, 1, 1], [], []>} : vector<16x128xf32>, vector<128x128xf32>, vector<16x128xf32> -> vector<16x128xf32>
    %c0_3 = arith.constant 0 : index
    %c0_4 = arith.constant 0 : index
    %3 = vector.load %arg3[%c0_3, %c0_4] : memref<1x128xf32, #tpu.memory_space<vmem>>, vector<1x128xf32>
    %4 = vector.broadcast %3 : vector<1x128xf32> to vector<16x128xf32>
    %5 = arith.addf %2, %4 : vector<16x128xf32>
    %cst_5 = arith.constant 0.000000e+00 : f32
    %6 = vector.broadcast %cst_5 : f32 to vector<16x128xf32>
    %7 = arith.maximumf %5, %6 : vector<16x128xf32>
    %c0_6 = arith.constant 0 : index
    %c0_7 = arith.constant 0 : index
    %8 = vector.load %arg1[%c0_6, %c0_7] : memref<16x128xf32, #tpu.memory_space<vmem>>, vector<16x128xf32>
    %c0_8 = arith.constant 0 : index
    %c0_9 = arith.constant 0 : index
    %9 = vector.load %arg4[%c0_8, %c0_9] : memref<128x128xf32, #tpu.memory_space<vmem>>, vector<128x128xf32>
    %cst_10 = arith.constant dense<0.000000e+00> : vector<16x128xf32>
    %10 = tpu.matmul %8, %9, %cst_10 {dimension_numbers = #tpu.dot_dimension_numbers<[1], [0], [0], [1], [0, 0, 1, 1], [], []>} : vector<16x128xf32>, vector<128x128xf32>, vector<16x128xf32> -> vector<16x128xf32>
    %c0_11 = arith.constant 0 : index
    %c0_12 = arith.constant 0 : index
    %11 = vector.load %arg5[%c0_11, %c0_12] : memref<128x128xf32, #tpu.memory_space<vmem>>, vector<128x128xf32>
    %cst_13 = arith.constant dense<0.000000e+00> : vector<16x128xf32>
    %12 = tpu.matmul %7, %11, %cst_13 {dimension_numbers = #tpu.dot_dimension_numbers<[1], [0], [0], [1], [0, 0, 1, 1], [], []>} : vector<16x128xf32>, vector<128x128xf32>, vector<16x128xf32> -> vector<16x128xf32>
    %c0_14 = arith.constant 0 : index
    %c0_15 = arith.constant 0 : index
    %13 = vector.load %arg6[%c0_14, %c0_15] : memref<128x128xf32, #tpu.memory_space<vmem>>, vector<128x128xf32>
    %cst_16 = arith.constant dense<0.000000e+00> : vector<16x128xf32>
    %14 = tpu.matmul %7, %13, %cst_16 {dimension_numbers = #tpu.dot_dimension_numbers<[1], [0], [0], [1], [0, 0, 1, 1], [], []>} : vector<16x128xf32>, vector<128x128xf32>, vector<16x128xf32> -> vector<16x128xf32>
    %15 = vector.shape_cast %10 : vector<16x128xf32> to vector<2x8x128xf32>
    %16 = vector.shape_cast %12 : vector<16x128xf32> to vector<2x8x128xf32>
    %17 = vector.shape_cast %14 : vector<16x128xf32> to vector<2x8x128xf32>
    %cst_17 = arith.constant dense<0.000000e+00> : vector<2x8x8xf32>
    %18 = tpu.matmul %15, %16, %cst_17 {dimension_numbers = #tpu.dot_dimension_numbers<[2], [2], [1], [1], [0, 0, 0, 1, 1, 1], [0], [0]>} : vector<2x8x128xf32>, vector<2x8x128xf32>, vector<2x8x8xf32> -> vector<2x8x8xf32>
    %cst_18 = arith.constant 0.0883883461 : f32
    %19 = vector.broadcast %cst_18 : f32 to vector<2x8x8xf32>
    %20 = arith.mulf %18, %19 : vector<2x8x8xf32>
    %cst_19 = arith.constant dense<0xFF800000> : vector<2x8xf32>
    %21 = vector.multi_reduction <maximumf>, %20, %cst_19 [2] : vector<2x8x8xf32> to vector<2x8xf32>
    %22 = vector.shape_cast %21 : vector<2x8xf32> to vector<2x8x1xf32>
    %23 = vector.broadcast %22 : vector<2x8x1xf32> to vector<2x8x8xf32>
    %24 = arith.subf %20, %23 : vector<2x8x8xf32>
    %25 = math.exp %24 : vector<2x8x8xf32>
    %cst_20 = arith.constant dense<0.000000e+00> : vector<2x8xf32>
    %26 = vector.multi_reduction <add>, %25, %cst_20 [2] : vector<2x8x8xf32> to vector<2x8xf32>
    %27 = vector.shape_cast %26 : vector<2x8xf32> to vector<2x8x1xf32>
    %28 = tpu.reciprocal %27 {approx = true} : vector<2x8x1xf32> -> vector<2x8x1xf32>
    %29 = vector.broadcast %28 : vector<2x8x1xf32> to vector<2x8x8xf32>
    %30 = arith.mulf %25, %29 : vector<2x8x8xf32>
    %cst_21 = arith.constant dense<0.000000e+00> : vector<2x8x128xf32>
    %31 = tpu.matmul %30, %17, %cst_21 {dimension_numbers = #tpu.dot_dimension_numbers<[2], [1], [1], [2], [0, 0, 0, 1, 1, 2], [0], [0]>} : vector<2x8x8xf32>, vector<2x8x128xf32>, vector<2x8x128xf32> -> vector<2x8x128xf32>
    %32 = vector.shape_cast %31 : vector<2x8x128xf32> to vector<16x128xf32>
    %c0_22 = arith.constant 0 : index
    %c0_23 = arith.constant 0 : index
    %33 = vector.load %arg7[%c0_22, %c0_23] : memref<128x128xf32, #tpu.memory_space<vmem>>, vector<128x128xf32>
    %cst_24 = arith.constant dense<0.000000e+00> : vector<16x128xf32>
    %34 = tpu.matmul %32, %33, %cst_24 {dimension_numbers = #tpu.dot_dimension_numbers<[1], [0], [0], [1], [0, 0, 1, 1], [], []>} : vector<16x128xf32>, vector<128x128xf32>, vector<16x128xf32> -> vector<16x128xf32>
    %c0_25 = arith.constant 0 : index
    %c0_26 = arith.constant 0 : index
    %35 = vector.load %arg8[%c0_25, %c0_26] : memref<1x128xf32, #tpu.memory_space<vmem>>, vector<1x128xf32>
    %36 = vector.broadcast %35 : vector<1x128xf32> to vector<16x128xf32>
    %37 = arith.addf %34, %36 : vector<16x128xf32>
    %c0_27 = arith.constant 0 : index
    %c0_28 = arith.constant 0 : index
    %38 = vector.load %arg9[%c0_27, %c0_28] : memref<128x128xf32, #tpu.memory_space<vmem>>, vector<128x128xf32>
    %cst_29 = arith.constant dense<0.000000e+00> : vector<16x128xf32>
    %39 = tpu.matmul %37, %38, %cst_29 {dimension_numbers = #tpu.dot_dimension_numbers<[1], [0], [0], [1], [0, 0, 1, 1], [], []>} : vector<16x128xf32>, vector<128x128xf32>, vector<16x128xf32> -> vector<16x128xf32>
    %c0_30 = arith.constant 0 : index
    %c0_31 = arith.constant 0 : index
    %40 = vector.load %arg10[%c0_30, %c0_31] : memref<1x128xf32, #tpu.memory_space<vmem>>, vector<1x128xf32>
    %41 = vector.broadcast %40 : vector<1x128xf32> to vector<16x128xf32>
    %42 = arith.addf %39, %41 : vector<16x128xf32>
    %c0_32 = arith.constant 0 : index
    %c0_33 = arith.constant 0 : index
    %43 = vector.load %arg11[%c0_32, %c0_33] : memref<16x128xf32, #tpu.memory_space<vmem>>, vector<16x128xf32>
    tpu.vector_store %arg11[%c0_32, %c0_33], %42 {strides = array<i32>} : memref<16x128xf32, #tpu.memory_space<vmem>>, vector<16x128xf32>,
    return
  }
}

</mosaic_0001>

<bundles_post_ra>
// kernel: tpu_custom_call.1
= control target key start
LH: loop header
LB: loop body
LE: loop exit
PB: predicated region body
PF: predicated region fallthrough
CT: control target
= control target key end

     0   :  { %16 = vsyncpa [#allocation3], 0  ;;  %s2084_s0 = inlined_call_operand.hbm [shape: f32[16,128], index: 0, kind: input, shape index: {}]   ;;  %s2085_s1 = inlined_call_operand.hbm [shape: f32[16,128], index: 1, kind: input, shape index: {}]   ;;  %s2086_s2 = inlined_call_operand.hbm [shape: f32[128,128], index: 2, kind: input, shape index: {}]   ;;  %s2087_s3 = inlined_call_operand.vmem [shape: f32[1,128], index: 3, kind: input, shape index: {}]   ;;  %s2088_s4 = inlined_call_operand.hbm [shape: f32[128,128], index: 4, kind: input, shape index: {}]   ;;  %s2089_s5 = inlined_call_operand.hbm [shape: f32[128,128], index: 5, kind: input, shape index: {}]   ;;  %s2090_s6 = inlined_call_operand.hbm [shape: f32[128,128], index: 6, kind: input, shape index: {}]   ;;  %s2091_s7 = inlined_call_operand.hbm [shape: f32[128,128], index: 7, kind: input, shape index: {}]   ;;  %s2092_s8 = inlined_call_operand.vmem [shape: f32[1,128], index: 8, kind: input, shape index: {}]   ;;  %s2093_s9 = inlined_call_operand.hbm [shape: f32[128,128], index: 9, kind: input, shape index: {}]   ;;  %s2094_s10 = inlined_call_operand.vmem [shape: f32[1,128], index: 10, kind: input, shape index: {}]   ;;  %s2095_s11 = inlined_call_operand.hbm [shape: f32[16,128], index: 11, kind: output, shape index: {}]  }
   0x1   :  { %17 = vsyncpa [#allocation6], 0 }
   0x2   :  { %18 = vsyncpa [#allocation9], 0 }
   0x3   :  { %19 = vsyncpa [#allocation12], 0 }
   0x4   :  { %20 = vsyncpa [#allocation15], 0 }
   0x5   :  { %21 = vsyncpa [#allocation4], 0  ;;  %s1829_s17 = smov [#allocation5]   ;;  %s1830_s19 = smov [#allocation8]  }
   0x6   :  { %s39_s18 = sshll.u32 %s1829_s17, 4  ;;  %s65_s20 = sshll.u32 %s1830_s19, 4  ;;  %s40_s18 = int_to_ptr.vmem [resolvable:$true] %s39_s18  ;;  %s1902_s20 = int_to_ptr.vmem [resolvable:$true] %s65_s20 }
   0x7   :  { %s1619_s23 = scalar_lea.hbm %s2085_s1, 256 }
   0x8   :  { %p1620_p0 = scmp.ne.s32.totalorder %s2085_s1, %s1619_s23  ;;  %p1623_p1 = scmp.lt.u32.totalorder %s1619_s23, %s2085_s1 }
   0xa   :  { %p1625_p2 = pnand %p1623_p1, %p1620_p0 }
   0xc   :  { %1628 = shalt.err (!%p1625_p2)
}
   0xd   :  { %s1629_s28 = scalar_lea.vmem %s40_s18, 256  ;;  %p1634_p4 = scmp.lt.s32.totalorder %s40_s18, %s40_s18 }
   0xe   :  { %p1630_p3 = scmp.ne.s32.totalorder %s40_s18, %s1629_s28  ;;  %p1635_p5 = scmp.lt.s32.totalorder %s1629_s28, %s1629_s28 }
  0x10   :  { %p1636_p6 = por %p1635_p5, %p1634_p4 }
  0x12   :  { %p1637_p7 = pnand %p1636_p6, %p1630_p3 }
  0x14   :  { %1640 = shalt.err (!%p1637_p7)
}
  0x15   :  { %s1831_s29 = smov 128   ;;  %s1832_s30 = smov 8  }
  0x16   :  { %45 = dma.hbm_to_vmem [thread:$0]  %s2085_s1, 256, %s40_s18, [#allocation6], %s1831_s29, %s1831_s29, %s1832_s30  }
  0x17   :  { %s1641_s16 = scalar_lea.hbm %s2088_s4, 2048 }
  0x18   :  { %p1642_p8 = scmp.ne.s32.totalorder %s2088_s4, %s1641_s16  ;;  %p1645_p9 = scmp.lt.u32.totalorder %s1641_s16, %s2088_s4 }
  0x1a   :  { %p1647_p10 = pnand %p1645_p9, %p1642_p8 }
  0x1c   :  { %1650 = shalt.err (!%p1647_p10)
}
  0x1d   :  { %s1651_s23 = scalar_lea.vmem %s1902_s20, 2048  ;;  %p1656_p12 = scmp.lt.s32.totalorder %s1902_s20, %s1902_s20 }
  0x1e   :  { %p1652_p11 = scmp.ne.s32.totalorder %s1902_s20, %s1651_s23  ;;  %p1657_p13 = scmp.lt.s32.totalorder %s1651_s23, %s1651_s23 }
  0x20   :  { %p1658_p0 = por %p1657_p13, %p1656_p12 }
  0x22   :  { %p1659_p1 = pnand %p1658_p0, %p1652_p11 }
  0x24   :  { %1662 = shalt.err (!%p1659_p1)
}
  0x25   :  { %71 = dma.hbm_to_vmem [thread:$0]  %s2088_s4, 2048, %s1902_s20, [#allocation9], %s1831_s29, %s1831_s29, %s1832_s30  }
  0x26   :  { %s1833_s24 = smov [#allocation11]   ;;  %s1834_s26 = smov [#allocation2]  }
  0x27   :  { %s89_s25 = sshll.u32 %s1833_s24, 4  ;;  %s27_s27 = sshll.u32 %s1834_s26, 4  ;;  %s90_s25 = int_to_ptr.vmem [resolvable:$true] %s89_s25  ;;  %s1939_s27 = int_to_ptr.vmem [resolvable:$true] %s27_s27 }
  0x28   :  { %s1663_s13 = scalar_lea.hbm %s2090_s6, 2048 }
  0x29   :  { %p1664_p2 = scmp.ne.s32.totalorder %s2090_s6, %s1663_s13  ;;  %p1667_p3 = scmp.lt.u32.totalorder %s1663_s13, %s2090_s6 }
  0x2b   :  { %p1669_p4 = pnand %p1667_p3, %p1664_p2 }
  0x2d   :  { %1672 = shalt.err (!%p1669_p4)
}
  0x2e   :  { %s1673_s4 = scalar_lea.vmem %s90_s25, 2048  ;;  %p1678_p6 = scmp.lt.s32.totalorder %s90_s25, %s90_s25 }
  0x2f   :  { %p1674_p5 = scmp.ne.s32.totalorder %s90_s25, %s1673_s4  ;;  %p1679_p7 = scmp.lt.s32.totalorder %s1673_s4, %s1673_s4 }
  0x31   :  { %p1680_p8 = por %p1679_p7, %p1678_p6 }
  0x33   :  { %p1681_p9 = pnand %p1680_p8, %p1674_p5 }
  0x35   :  { %1684 = shalt.err (!%p1681_p9)
}
  0x36   :  { %95 = dma.hbm_to_vmem [thread:$0]  %s2090_s6, 2048, %s90_s25, [#allocation12], %s1831_s29, %s1831_s29, %s1832_s30  }
  0x37   :  { %s1685_s23 = scalar_lea.hbm %s2084_s0, 256 }
  0x38   :  { %p1686_p10 = scmp.ne.s32.totalorder %s2084_s0, %s1685_s23  ;;  %p1689_p11 = scmp.lt.u32.totalorder %s1685_s23, %s2084_s0 }
  0x3a   :  { %p1691_p12 = pnand %p1689_p11, %p1686_p10 }
  0x3c   :  { %1694 = shalt.err (!%p1691_p12)
}
  0x3d   :  { %s1695_s28 = scalar_lea.vmem %s1939_s27, 256  ;;  %p1700_p0 = scmp.lt.s32.totalorder %s1939_s27, %s1939_s27 }
  0x3e   :  { %p1696_p13 = scmp.ne.s32.totalorder %s1939_s27, %s1695_s28  ;;  %p1701_p1 = scmp.lt.s32.totalorder %s1695_s28, %s1695_s28 }
  0x40   :  { %p1702_p2 = por %p1701_p1, %p1700_p0 }
  0x42   :  { %p1703_p3 = pnand %p1702_p2, %p1696_p13 }
  0x44   :  { %1706 = shalt.err (!%p1703_p3)
}
  0x45   :  { %33 = dma.hbm_to_vmem [thread:$0]  %s2084_s0, 256, %s1939_s27, [#allocation3], %s1831_s29, %s1831_s29, %s1832_s30  }
  0x46   :  { %s1835_s12 = smov [#allocation7]   ;;  %s1836_s14 = smov [#allocation10]  }
  0x47   :  { %s51_s13 = sshll.u32 %s1835_s12, 4  ;;  %s77_s15 = sshll.u32 %s1836_s14, 4  ;;  %s52_s13 = int_to_ptr.vmem [resolvable:$true] %s51_s13  ;;  %s1976_s15 = int_to_ptr.vmem [resolvable:$true] %s77_s15 }
  0x48   :  { %s1707_s4 = scalar_lea.hbm %s2086_s2, 2048 }
  0x49   :  { %p1708_p4 = scmp.ne.s32.totalorder %s2086_s2, %s1707_s4  ;;  %p1711_p5 = scmp.lt.u32.totalorder %s1707_s4, %s2086_s2 }
  0x4b   :  { %p1713_p6 = pnand %p1711_p5, %p1708_p4 }
  0x4d   :  { %1716 = shalt.err (!%p1713_p6)
}
  0x4e   :  { %s1717_s0 = scalar_lea.vmem %s52_s13, 2048  ;;  %p1722_p8 = scmp.lt.s32.totalorder %s52_s13, %s52_s13 }
  0x4f   :  { %p1718_p7 = scmp.ne.s32.totalorder %s52_s13, %s1717_s0  ;;  %p1723_p9 = scmp.lt.s32.totalorder %s1717_s0, %s1717_s0 }
  0x51   :  { %p1724_p10 = por %p1723_p9, %p1722_p8 }
  0x53   :  { %p1725_p11 = pnand %p1724_p10, %p1718_p7 }
  0x55   :  { %1728 = shalt.err (!%p1725_p11)
}
  0x56   :  { %57 = dma.hbm_to_vmem [thread:$0]  %s2086_s2, 2048, %s52_s13, [#allocation6], %s1831_s29, %s1831_s29, %s1832_s30  }
  0x57   :  { %s1729_s24 = scalar_lea.hbm %s2089_s5, 2048 }
  0x58   :  { %p1730_p12 = scmp.ne.s32.totalorder %s2089_s5, %s1729_s24  ;;  %p1733_p13 = scmp.lt.u32.totalorder %s1729_s24, %s2089_s5 }
  0x5a   :  { %p1735_p0 = pnand %p1733_p13, %p1730_p12 }
  0x5c   :  { %1738 = shalt.err (!%p1735_p0)
}
  0x5d   :  { %s1739_s12 = scalar_lea.vmem %s1976_s15, 2048  ;;  %p1744_p2 = scmp.lt.s32.totalorder %s1976_s15, %s1976_s15 }
  0x5e   :  { %p1740_p1 = scmp.ne.s32.totalorder %s1976_s15, %s1739_s12  ;;  %p1745_p3 = scmp.lt.s32.totalorder %s1739_s12, %s1739_s12 }
  0x60   :  { %p1746_p4 = por %p1745_p3, %p1744_p2 }
  0x62   :  { %p1747_p5 = pnand %p1746_p4, %p1740_p1 }
  0x64   :  { %1750 = shalt.err (!%p1747_p5)
}
  0x65   :  { %83 = dma.hbm_to_vmem [thread:$0]  %s2089_s5, 2048, %s1976_s15, [#allocation9], %s1831_s29, %s1831_s29, %s1832_s30  }
  0x66   :  { %s1837_s14 = smov [#allocation13]   ;;  %s1838_s17 = smov [#allocation14]  }
  0x67   :  { %s101_s16 = sshll.u32 %s1837_s14, 4  ;;  %s115_s4 = sshll.u32 %s1838_s17, 4  ;;  %s102_s16 = int_to_ptr.vmem [resolvable:$true] %s101_s16  ;;  %s2013_s4 = int_to_ptr.vmem [resolvable:$true] %s115_s4 }
  0x68   :  { %s1751_s21 = scalar_lea.hbm %s2091_s7, 2048 }
  0x69   :  { %p1752_p6 = scmp.ne.s32.totalorder %s2091_s7, %s1751_s21  ;;  %p1755_p7 = scmp.lt.u32.totalorder %s1751_s21, %s2091_s7 }
  0x6b   :  { %p1757_p8 = pnand %p1755_p7, %p1752_p6 }
  0x6d   :  { %1760 = shalt.err (!%p1757_p8)
}
  0x6e   :  { %s1761_s5 = scalar_lea.vmem %s102_s16, 2048  ;;  %p1766_p10 = scmp.lt.s32.totalorder %s102_s16, %s102_s16 }
  0x6f   :  { %p1762_p9 = scmp.ne.s32.totalorder %s102_s16, %s1761_s5  ;;  %p1767_p11 = scmp.lt.s32.totalorder %s1761_s5, %s1761_s5 }
  0x71   :  { %p1768_p12 = por %p1767_p11, %p1766_p10 }
  0x73   :  { %p1769_p13 = pnand %p1768_p12, %p1762_p9 }
  0x75   :  { %1772 = shalt.err (!%p1769_p13)
}
  0x76   :  { %107 = dma.hbm_to_vmem [thread:$0]  %s2091_s7, 2048, %s102_s16, [#allocation12], %s1831_s29, %s1831_s29, %s1832_s30  }
  0x77   :  { %s1773_s26 = scalar_lea.hbm %s2093_s9, 2048 }
  0x78   :  { %p1774_p0 = scmp.ne.s32.totalorder %s2093_s9, %s1773_s26  ;;  %p1777_p1 = scmp.lt.u32.totalorder %s1773_s26, %s2093_s9 }
  0x7a   :  { %p1779_p2 = pnand %p1777_p1, %p1774_p0 }
  0x7c   :  { %1782 = shalt.err (!%p1779_p2)
}
  0x7d   :  { %s1783_s2 = scalar_lea.vmem %s2013_s4, 2048  ;;  %p1788_p4 = scmp.lt.s32.totalorder %s2013_s4, %s2013_s4 }
  0x7e   :  { %p1784_p3 = scmp.ne.s32.totalorder %s2013_s4, %s1783_s2  ;;  %p1789_p5 = scmp.lt.s32.totalorder %s1783_s2, %s1783_s2 }
  0x80   :  { %p1790_p6 = por %p1789_p5, %p1788_p4 }
  0x82   :  { %p1791_p7 = pnand %p1790_p6, %p1784_p3 }
  0x84   :  { %1794 = shalt.err (!%p1791_p7)
}
  0x85   :  { %121 = dma.hbm_to_vmem [thread:$0]  %s2093_s9, 2048, %s2013_s4, [#allocation15], %s1831_s29, %s1831_s29, %s1832_s30  }
  0x86   :  { %1817 = dma.done.wait [#allocation3], 256  }
  0x87   :  { %1818 = vsyncadd [#allocation3], 4294967040 }
  0x88   :  { %1819 = dma.done.wait [#allocation6], 2304  }
  0x89   :  { %1820 = vsyncadd [#allocation6], 4294964992 }
  0x8a   :  { %1821 = dma.done.wait [#allocation9], 4096  }
  0x8b   :  { %1822 = vsyncadd [#allocation9], 4294963200 }
  0x8c   :  { %1823 = dma.done.wait [#allocation12], 4096  }
  0x8d   :  { %1824 = vsyncadd [#allocation12], 4294963200 }
  0x8e   :  { %1825 = dma.done.wait [#allocation15], 2048  }
  0x8f   :  { %1826 = vsyncadd [#allocation15], 4294965248  ;;  %v150_v0 = vld [vmem:[#allocation7] sm:$0xff]  ;;  %v151_v1 = vld [vmem:[#allocation7 + $0x8] sm:$0xff]  ;;  %vm1840_vm0 = vmmov 0   ;;  %vm667_vm1 = vcmask 64512  }
  0x90   :  { %v152_v2 = vld [vmem:[#allocation7 + $0x10] sm:$0xff]  ;;  %v1406_v3 = vpack.c.bf16 %v151_v1, %v150_v0  ;;  %v153_v4 = vld [vmem:[#allocation7 + $0x18] sm:$0xff]  ;;  %v154_v6 = vld [vmem:[#allocation7 + $0x20] sm:$0xff]  ;;  %s1841_s20 = smov [#allocation16]  }
  0x91   :  { %v1410_v5 = vpack.c.bf16 %v153_v4, %v152_v2  ;;  %v155_v7 = vld [vmem:[#allocation7 + $0x28] sm:$0xff]  ;;  %v156_v9 = vld [vmem:[#allocation7 + $0x30] sm:$0xff]  ;;  %v157_v10 = vld [vmem:[#allocation7 + $0x38] sm:$0xff]  ;;  %s1039_s19 = sshll.u32 %s1841_s20, 4  ;;  %s1040_s19 = int_to_ptr.vmem [resolvable:$true] %s1039_s19 }
  0x92   :  { %1407 = vmatprep.subr.bf16.mxu0 %v1406_v3  ;;  %v1414_v8 = vpack.c.bf16 %v155_v7, %v154_v6  ;;  %v148_v11 = vld [vmem:[#allocation2] sm:$0xff]  ;;  %v253_v13 = vld [vmem:[#allocation8 + $0x8] sm:$0xff]  ;;  %v254_v14 = vld [vmem:[#allocation8 + $0x10] sm:$0xff]  ;;  %v1418_v20 = vpack.c.bf16 %v157_v10, %v156_v9  ;;  %p1800_p9 = scmp.lt.s32.totalorder %s1040_s19, %s1040_s19 }
  0x93   :  { %1409 = vmatpush3.bf16.msra.mxu0 %v1406_v3  ;;  %1208 = vmatprep.mubr.f32.mxu0 %v148_v11  ;;  %v252_v12 = vld [vmem:[#allocation8] sm:$0xff]  ;;  %v255_v16 = vld [vmem:[#allocation8 + $0x18] sm:$0xff]  ;;  %v257_v19 = vld [vmem:[#allocation8 + $0x28] sm:$0xff] }
  0x94   :  { %1411 = vmatprep.subr.bf16.mxu0 %v1410_v5  ;;  %v1438_v15 = vpack.c.bf16 %v253_v13, %v252_v12  ;;  %v1442_v17 = vpack.c.bf16 %v255_v16, %v254_v14  ;;  %v256_v18 = vld [vmem:[#allocation8 + $0x20] sm:$0xff]  ;;  %v159_v22 = vld [vmem:[#allocation7 + $0x48] sm:$0xff]  ;;  %v250_v24 = vld [vmem:[#allocation5] sm:$0xff] }
  0x95   :  { %v158_v21 = vld [vmem:[#allocation7 + $0x40] sm:$0xff]  ;;  %v1446_v23 = vpack.c.bf16 %v257_v19, %v256_v18  ;;  %v258_v25 = vld [vmem:[#allocation8 + $0x30] sm:$0xff]  ;;  %v259_v26 = vld [vmem:[#allocation8 + $0x38] sm:$0xff]  ;;  %1243 = vmatprep.mubr.f32.mxu1 %v250_v24 }
  0x96   :  { %1439 = vmatprep.subr.bf16.mxu1 %v1438_v15  ;;  %v1422_v27 = vpack.c.bf16 %v159_v22, %v158_v21  ;;  %v160_v28 = vld [vmem:[#allocation7 + $0x50] sm:$0xff]  ;;  %v161_v29 = vld [vmem:[#allocation7 + $0x58] sm:$0xff]  ;;  %v1450_v30 = vpack.c.bf16 %v259_v26, %v258_v25  ;;  %v260_v31 = vld [vmem:[#allocation8 + $0x40] sm:$0xff] }
  0x97   :  { %1413 = vmatpush3.bf16.msra.mxu0 %v1410_v5  ;;  %1441 = vmatpush3.bf16.msra.mxu1 %v1438_v15  ;;  %v261_v32 = vld [vmem:[#allocation8 + $0x48] sm:$0xff]  ;;  %v1426_v33 = vpack.c.bf16 %v161_v29, %v160_v28  ;;  %v162_v34 = vld [vmem:[#allocation7 + $0x60] sm:$0xff]  ;;  %v262_v37 = vld [vmem:[#allocation8 + $0x50] sm:$0xff] }
  0x98   :  { %1415 = vmatprep.subr.bf16.mxu0 %v1414_v8  ;;  %1443 = vmatprep.subr.bf16.mxu1 %v1442_v17  ;;  %v163_v35 = vld [vmem:[#allocation7 + $0x68] sm:$0xff]  ;;  %v1454_v36 = vpack.c.bf16 %v261_v32, %v260_v31  ;;  %v263_v38 = vld [vmem:[#allocation8 + $0x58] sm:$0xff]  ;;  %v164_v40 = vld [vmem:[#allocation7 + $0x70] sm:$0xff] }
  0x99   :  { %v1430_v39 = vpack.c.bf16 %v163_v35, %v162_v34  ;;  %v165_v41 = vld [vmem:[#allocation7 + $0x78] sm:$0xff]  ;;  %v1458_v42 = vpack.c.bf16 %v263_v38, %v262_v37  ;;  %v264_v43 = vld [vmem:[#allocation8 + $0x60] sm:$0xff]  ;;  %v265_v44 = vld [vmem:[#allocation8 + $0x68] sm:$0xff] }
  0x9a   :  { %v1434_v45 = vpack.c.bf16 %v165_v41, %v164_v40  ;;  %v343_v46 = vld [vmem:[#allocation10] sm:$0xff]  ;;  %v344_v47 = vld [vmem:[#allocation10 + $0x8] sm:$0xff]  ;;  %v1462_v48 = vpack.c.bf16 %v265_v44, %v264_v43  ;;  %v266_v49 = vld [vmem:[#allocation8 + $0x70] sm:$0xff] }
  0x9b   :  { %1417 = vmatpush3.bf16.msra.mxu0 %v1414_v8  ;;  %1445 = vmatpush3.bf16.msra.mxu1 %v1442_v17  ;;  %v267_v50 = vld [vmem:[#allocation8 + $0x78] sm:$0xff]  ;;  %v1470_v51 = vpack.c.bf16 %v344_v47, %v343_v46  ;;  %v345_v52 = vld [vmem:[#allocation10 + $0x10] sm:$0xff]  ;;  %v149_v55 = vld [vmem:[#allocation2 + $0x8] sm:$0xff] }
  0x9c   :  { %1419 = vmatprep.subr.bf16.mxu0 %v1418_v20  ;;  %1447 = vmatprep.subr.bf16.mxu1 %v1446_v23  ;;  %v346_v53 = vld [vmem:[#allocation10 + $0x18] sm:$0xff]  ;;  %v1466_v54 = vpack.c.bf16 %v267_v50, %v266_v49  ;;  %v434_v56 = vld [vmem:[#allocation11] sm:$0xff]  ;;  %v435_v57 = vld [vmem:[#allocation11 + $0x8] sm:$0xff] }
  0x9d   :  { %v1474_v58 = vpack.c.bf16 %v346_v53, %v345_v52  ;;  %v347_v59 = vld [vmem:[#allocation10 + $0x20] sm:$0xff]  ;;  %v348_v60 = vld [vmem:[#allocation10 + $0x28] sm:$0xff]  ;;  %v1502_v61 = vpack.c.bf16 %v435_v57, %v434_v56  ;;  %v436_v62 = vld [vmem:[#allocation11 + $0x10] sm:$0xff] }
  0x9e   :  { %v437_v63 = vld [vmem:[#allocation11 + $0x18] sm:$0xff]  ;;  %v1478_v0 = vpack.c.bf16 %v348_v60, %v347_v59  ;;  %v349_v2 = vld [vmem:[#allocation10 + $0x30] sm:$0xff]  ;;  %v438_v5 = vld [vmem:[#allocation11 + $0x20] sm:$0xff] }
  0x9f   :  { %1421 = vmatpush3.bf16.msra.mxu0 %v1418_v20  ;;  %1449 = vmatpush3.bf16.msra.mxu1 %v1446_v23  ;;  %v251_v1 = vld [vmem:[#allocation5 + $0x8] sm:$0xff]  ;;  %v1506_v4 = vpack.c.bf16 %v437_v63, %v436_v62  ;;  %v439_v6 = vld [vmem:[#allocation11 + $0x28] sm:$0xff]  ;;  %v351_v8 = vld [vmem:[#allocation10 + $0x40] sm:$0xff] }
  0xa0   :  { %1423 = vmatprep.subr.bf16.mxu0 %v1422_v27  ;;  %1451 = vmatprep.subr.bf16.mxu1 %v1450_v30  ;;  %v350_v3 = vld [vmem:[#allocation10 + $0x38] sm:$0xff]  ;;  %v352_v9 = vld [vmem:[#allocation10 + $0x48] sm:$0xff]  ;;  %v1510_v10 = vpack.c.bf16 %v439_v6, %v438_v5  ;;  %v440_v11 = vld [vmem:[#allocation11 + $0x30] sm:$0xff] }
  0xa1   :  { %v1482_v7 = vpack.c.bf16 %v350_v3, %v349_v2  ;;  %v441_v12 = vld [vmem:[#allocation11 + $0x38] sm:$0xff]  ;;  %v1486_v13 = vpack.c.bf16 %v352_v9, %v351_v8  ;;  %v353_v14 = vld [vmem:[#allocation10 + $0x50] sm:$0xff]  ;;  %v442_v17 = vld [vmem:[#allocation11 + $0x40] sm:$0xff] }
  0xa2   :  { %v354_v15 = vld [vmem:[#allocation10 + $0x58] sm:$0xff]  ;;  %v1514_v16 = vpack.c.bf16 %v441_v12, %v440_v11  ;;  %v443_v18 = vld [vmem:[#allocation11 + $0x48] sm:$0xff]  ;;  %v355_v20 = vld [vmem:[#allocation10 + $0x60] sm:$0xff] }
  0xa3   :  { %1425 = vmatpush3.bf16.msra.mxu0 %v1422_v27  ;;  %1453 = vmatpush3.bf16.msra.mxu1 %v1450_v30  ;;  %v1490_v19 = vpack.c.bf16 %v354_v15, %v353_v14  ;;  %v356_v21 = vld [vmem:[#allocation10 + $0x68] sm:$0xff]  ;;  %v1518_v22 = vpack.c.bf16 %v443_v18, %v442_v17  ;;  %v444_v23 = vld [vmem:[#allocation11 + $0x50] sm:$0xff]  ;;  %v445_v24 = vld [vmem:[#allocation11 + $0x58] sm:$0xff] }
  0xa4   :  { %1427 = vmatprep.subr.bf16.mxu0 %v1426_v33  ;;  %1455 = vmatprep.subr.bf16.mxu1 %v1454_v36  ;;  %v1494_v25 = vpack.c.bf16 %v356_v21, %v355_v20  ;;  %v1522_v26 = vpack.c.bf16 %v445_v24, %v444_v23  ;;  %v446_v27 = vld [vmem:[#allocation11 + $0x60] sm:$0xff]  ;;  %v447_v28 = vld [vmem:[#allocation11 + $0x68] sm:$0xff]  ;;  %v357_v30 = vld [vmem:[#allocation10 + $0x70] sm:$0xff] }
  0xa5   :  { %v1526_v29 = vpack.c.bf16 %v447_v28, %v446_v27  ;;  %v358_v31 = vld [vmem:[#allocation10 + $0x78] sm:$0xff]  ;;  %v837_v5 = vld [vmem:[#allocation13 + $0x8] sm:$0xff]  ;;  %v838_v9 = vld [vmem:[#allocation13 + $0x10] sm:$0xff] }
  0xa6   :  { %v1498_v32 = vpack.c.bf16 %v358_v31, %v357_v30  ;;  %v449_v34 = vld [vmem:[#allocation11 + $0x78] sm:$0xff]  ;;  %v840_v14 = vld [vmem:[#allocation13 + $0x20] sm:$0xff]  ;;  %v841_v15 = vld [vmem:[#allocation13 + $0x28] sm:$0xff] }
  0xa7   :  { %1429 = vmatpush3.bf16.msra.mxu0 %v1426_v33  ;;  %1457 = vmatpush3.bf16.msra.mxu1 %v1454_v36  ;;  %v448_v33 = vld [vmem:[#allocation11 + $0x70] sm:$0xff]  ;;  %v1055_v36 = vld [vmem:[%s2087_s3] ss:$0 sm:$0xff]  ;;  %v1542_v18 = vpack.c.bf16 %v841_v15, %v840_v14  ;;  %v843_v20 = vld [vmem:[#allocation13 + $0x38] sm:$0xff] }
  0xa8   :  { %1431 = vmatprep.subr.bf16.mxu0 %v1430_v39  ;;  %1459 = vmatprep.subr.bf16.mxu1 %v1458_v42  ;;  %v1530_v35 = vpack.c.bf16 %v449_v34, %v448_v33  ;;  %v845_v23 = vld [vmem:[#allocation13 + $0x48] sm:$0xff]  ;;  %v848_v28 = vld [vmem:[#allocation13 + $0x60] sm:$0xff]  ;;  %v850_v31 = vld [vmem:[#allocation13 + $0x70] sm:$0xff] }
  0xa9   :  { %v934_v34 = vld [vmem:[#allocation14] sm:$0xff] }
  0xab   :  { %1433 = vmatpush3.bf16.msra.mxu0 %v1430_v39  ;;  %1461 = vmatpush3.bf16.msra.mxu1 %v1458_v42 }
  0xac   :  { %1435 = vmatprep.subr.bf16.mxu0 %v1434_v45  ;;  %1463 = vmatprep.subr.bf16.mxu1 %v1462_v48 }
  0xaf   :  { %1437 = vmatpush3.bf16.msra.mxu0 %v1434_v45  ;;  %1465 = vmatpush3.bf16.msra.mxu1 %v1462_v48  ;;  %v1839_v45 = vmov 0.0  }
  0xb0   :  { %1471 = vmatprep.subr.bf16.mxu0 %v1470_v51  ;;  %1467 = vmatprep.subr.bf16.mxu1 %v1466_v54 }
  0xb2   :  { %1209 = vmatmul.mubr.f32.vlgmr.msra.gmra.mrb[0].mxu0 %v149_v55 }
  0xb3   :  { %1473 = vmatpush3.bf16.msra.mxu0 %v1470_v51  ;;  %1469 = vmatpush3.bf16.msra.mxu1 %v1466_v54 }
  0xb4   :  { %1475 = vmatprep.subr.bf16.mxu0 %v1474_v58  ;;  %1503 = vmatprep.subr.bf16.mxu1 %v1502_v61 }
  0xb6   :  { %1244 = vmatmul.mubr.f32.vlgmr.msra.gmra.mrb[0].mxu1 %v251_v1 }
  0xb7   :  { %1477 = vmatpush3.bf16.msra.mxu0 %v1474_v58  ;;  %1505 = vmatpush3.bf16.msra.mxu1 %v1502_v61 }
  0xb8   :  { %1479 = vmatprep.subr.bf16.mxu0 %v1478_v0  ;;  %1507 = vmatprep.subr.bf16.mxu1 %v1506_v4 }
  0xbb   :  { %1481 = vmatpush3.bf16.msra.mxu0 %v1478_v0  ;;  %1509 = vmatpush3.bf16.msra.mxu1 %v1506_v4  ;;  %v836_v4 = vld [vmem:[#allocation13] sm:$0xff] }
  0xbc   :  { %1483 = vmatprep.subr.bf16.mxu0 %v1482_v7  ;;  %1511 = vmatprep.subr.bf16.mxu1 %v1510_v10  ;;  %v1534_v6 = vpack.c.bf16 %v837_v5, %v836_v4 }
  0xbf   :  { %1485 = vmatpush3.bf16.msra.mxu0 %v1482_v7  ;;  %1513 = vmatpush3.bf16.msra.mxu1 %v1510_v10  ;;  %v839_v10 = vld [vmem:[#allocation13 + $0x18] sm:$0xff] }
  0xc0   :  { %1487 = vmatprep.subr.bf16.mxu0 %v1486_v13  ;;  %1515 = vmatprep.subr.bf16.mxu1 %v1514_v16 }
  0xc3   :  { %1489 = vmatpush3.bf16.msra.mxu0 %v1486_v13  ;;  %1517 = vmatpush3.bf16.msra.mxu1 %v1514_v16  ;;  %v1538_v13 = vpack.c.bf16 %v839_v10, %v838_v9 }
  0xc4   :  { %1491 = vmatprep.subr.bf16.mxu0 %v1490_v19  ;;  %1519 = vmatprep.subr.bf16.mxu1 %v1518_v22 }
  0xc7   :  { %1493 = vmatpush3.bf16.msra.mxu0 %v1490_v19  ;;  %1521 = vmatpush3.bf16.msra.mxu1 %v1518_v22  ;;  %v842_v19 = vld [vmem:[#allocation13 + $0x30] sm:$0xff]  ;;  %v844_v22 = vld [vmem:[#allocation13 + $0x40] sm:$0xff] }
  0xc8   :  { %1495 = vmatprep.subr.bf16.mxu0 %v1494_v25  ;;  %1523 = vmatprep.subr.bf16.mxu1 %v1522_v26  ;;  %v1546_v21 = vpack.c.bf16 %v843_v20, %v842_v19  ;;  %v1550_v24 = vpack.c.bf16 %v845_v23, %v844_v22 }
  0xcb   :  { %1497 = vmatpush3.bf16.msra.mxu0 %v1494_v25  ;;  %1525 = vmatpush3.bf16.msra.mxu1 %v1522_v26  ;;  %v846_v25 = vld [vmem:[#allocation13 + $0x50] sm:$0xff]  ;;  %v847_v26 = vld [vmem:[#allocation13 + $0x58] sm:$0xff] }
  0xcc   :  { %1527 = vmatprep.subr.bf16.mxu1 %v1526_v29  ;;  %1499 = vmatprep.subr.bf16.mxu0 %v1498_v32  ;;  %v1554_v27 = vpack.c.bf16 %v847_v26, %v846_v25 }
  0xcf   :  { %1529 = vmatpush3.bf16.msra.mxu1 %v1526_v29  ;;  %1501 = vmatpush3.bf16.msra.mxu0 %v1498_v32  ;;  %v849_v29 = vld [vmem:[#allocation13 + $0x68] sm:$0xff]  ;;  %v851_v32 = vld [vmem:[#allocation13 + $0x78] sm:$0xff] }
  0xd0   :  { %1531 = vmatprep.subr.bf16.mxu1 %v1530_v35  ;;  %1316 = vmatprep.subr.mxu0 %v1839_v45  ;;  %v1558_v30 = vpack.c.bf16 %v849_v29, %v848_v28  ;;  %v1562_v33 = vpack.c.bf16 %v851_v32, %v850_v31 }
  0xd3   :  { %1533 = vmatpush3.bf16.msra.mxu1 %v1530_v35  ;;  %v935_v35 = vld [vmem:[#allocation14 + $0x8] sm:$0xff] }
  0xd4   :  { %1321 = vmatprep.subr.mxu1 %v1839_v45 }
 0x185   :  { %v1210_v37 = vpop.f32.mrb[0].mxu0 }
 0x186   :  { %v245_v38 = vadd.f32 %v1210_v37, %v1055_v36  ;;  %v239_v39 = vpop.f32.mrb[1].mxu0  ;;  %v1566_v37 = vpack.c.bf16 %v935_v35, %v934_v34 }
 0x187   :  { %v240_v40 = vadd.f32 %v1055_v36, %v239_v39  ;;  %v936_v36 = vld [vmem:[#allocation14 + $0x10] sm:$0xff] }
 0x188   :  { %v249_v42 = vmax.f32 %v245_v38, 0.0  ;;  %v937_v38 = vld [vmem:[#allocation14 + $0x18] sm:$0xff] }
 0x189   :  { %v248_v41 = vmax.f32 %v240_v40, 0.0  ;;  %v1245_v43 = vpop.f32.mrb[0].mxu1  ;;  %v1570_v39 = vpack.c.bf16 %v937_v38, %v936_v36  ;;  %v938_v40 = vld [vmem:[#allocation14 + $0x20] sm:$0xff] }
 0x18a   :  { %v334_v44 = vpop.f32.mrb[1].mxu1 }
 0x18b   :  { %1278 = vmatprep.mubr.f32.mxu0 %v248_v41  ;;  %1313 = vmatprep.mubr.f32.mxu1 %v248_v41  ;;  %v939_v41 = vld [vmem:[#allocation14 + $0x28] sm:$0xff] }
 0x18c   :  { %1279 = vmatmul.mubr.f32.vlgmr.msra.gmra.mrb[2].mxu0 %v249_v42  ;;  %1314 = vmatmul.mubr.f32.vlgmr.msra.gmra.mrb[2].mxu1 %v249_v42  ;;  %v1574_v42 = vpack.c.bf16 %v939_v41, %v938_v40 }
 0x18d   :  { %1323 = vmatprep.mubr.msk.f32.mxu1 %vm1840_vm0, %v1839_v45  ;;  %1318 = vmatprep.mubr.msk.f32.mxu0 %vm1840_vm0, %v1839_v45 }
 0x25f   :  { %v1280_v46 = vpop.f32.mrb[2].mxu0  ;;  %v1315_v47 = vpop.f32.mrb[2].mxu1 }
 0x260   :  { %v425_v48 = vpop.f32.mrb[3].mxu0  ;;  %v516_v49 = vpop.f32.mrb[3].mxu1  ;;  %1322 = vmatpush3.xpose.msra.mxu1 %v1280_v46  ;;  %v942_v46 = vld [vmem:[#allocation14 + $0x40] sm:$0xff] }
 0x261   :  { %1317 = vmatpush3.xpose.msra.mxu0 %v425_v48  ;;  %1331 = vmatprep.subr.mxu1 %v1839_v45 }
 0x262   :  { %1326 = vmatprep.subr.mxu0 %v1839_v45 }
 0x263   :  { %1324 = vmatmul.mubr.f32.vlgmr.msra.gmra.mrb[4].mxu1 %v1245_v43  ;;  %v940_v43 = vld [vmem:[#allocation14 + $0x30] sm:$0xff] }
 0x264   :  { %1319 = vmatmul.mubr.f32.vlgmr.msra.gmra.mrb[4].mxu0 %v334_v44  ;;  %1332 = vmatpush3.msra.mxu1 %v1315_v47  ;;  %v941_v44 = vld [vmem:[#allocation14 + $0x38] sm:$0xff]  ;;  %v943_v47 = vld [vmem:[#allocation14 + $0x48] sm:$0xff] }
 0x265   :  { %1327 = vmatpush3.msra.mxu0 %v516_v49  ;;  %1328 = vmatprep.mubr.msk.f32.mxu0 %vm1840_vm0, %v1839_v45  ;;  %v1582_v48 = vpack.c.bf16 %v943_v47, %v942_v46  ;;  %v944_v49 = vld [vmem:[#allocation14 + $0x50] sm:$0xff] }
 0x266   :  { %1333 = vmatprep.mubr.msk.f32.mxu1 %vm1840_vm0, %v1839_v45  ;;  %1535 = vmatprep.subr.bf16.mxu0 %v1534_v6  ;;  %v1578_v45 = vpack.c.bf16 %v941_v44, %v940_v43 }
 0x267   :  { %1567 = vmatprep.subr.bf16.mxu1 %v1566_v37 }
 0x336   :  { %v661_v50 = vpop.f32.mrb[4].mxu1 }
 0x337   :  { %v591_v51 = vpop.f32.mrb[4].mxu0  ;;  %v1325_v52 = vpop.f32.mrb[5].mxu1  ;;  %v666_v55 = vmul.f32 0.088388346, %v661_v50  ;;  %v945_v50 = vld [vmem:[#allocation14 + $0x58] sm:$0xff] }
 0x338   :  { %v665_v53 = vmul.f32 0.088388346, %v591_v51  ;;  %v1320_v54 = vpop.f32.mrb[5].mxu0  ;;  %v1586_v51 = vpack.c.bf16 %v945_v50, %v944_v49  ;;  %v946_v52 = vld [vmem:[#allocation14 + $0x60] sm:$0xff] }
 0x339   :  { %v671_v57 = vsel %vm667_vm1, %v666_v55, -inf }
 0x33a   :  { %v668_v56 = vsel %vm667_vm1, %v665_v53, -inf }
 0x33b   :  { %669 = vmax.xlane.f32.xlu0 %v668_v56 }
 0x33f   :  { %672 = vmax.xlane.f32.xlu0 %v671_v57 }
 0x3c8   :  { %v670_v58 = vpop.xlane.xlu0 %669 }
 0x3c9   :  { %v674_v59 = vsub.f32 %v665_v53, %v670_v58  ;;  %v947_v53 = vld [vmem:[#allocation14 + $0x68] sm:$0xff] }
 0x3ca   :  { %v1590_v54 = vpack.c.bf16 %v947_v53, %v946_v52 }
 0x3cb   :  { %v676_v60 = vmul.f32 1.442695, %v674_v59  ;;  %v948_v59 = vld [vmem:[#allocation14 + $0x70] sm:$0xff] }
 0x3cc   :  { %v673_v61 = vpop.xlane.xlu0 %672 }
 0x3cd   :  { %1611 = vpow2.f32 %v676_v60  ;;  %v675_v62 = vsub.f32 %v666_v55, %v673_v61  ;;  %v949_v60 = vld [vmem:[#allocation14 + $0x78] sm:$0xff] }
 0x3ce   :  { %v1594_v61 = vpack.c.bf16 %v949_v60, %v948_v59 }
 0x3cf   :  { %v678_v63 = vmul.f32 1.442695, %v675_v62  ;;  %v1058_v62 = vld [vmem:[%s2092_s8] ss:$0 sm:$0xff]  ;;  %s1795_s8 = scalar_lea.vmem %s1040_s19, 256 }
 0x3d0   :  { %p1796_p8 = scmp.ne.s32.totalorder %s1040_s19, %s1795_s8  ;;  %p1801_p10 = scmp.lt.s32.totalorder %s1795_s8, %s1795_s8 }
 0x3d1   :  { %1613 = vpow2.f32 %v678_v63 }
 0x3d2   :  { %p1802_p11 = por %p1801_p10, %p1800_p9 }
 0x3d4   :  { %p1803_p12 = pnand %p1802_p11, %p1796_p8 }
 0x3d7   :  { %v1612_v0 = vpop.eup %1611 }
 0x3d8   :  { %v680_v1 = vsel %vm667_vm1, %v1612_v0, 0.0 }
 0x3d9   :  { %681 = vadd.xlane.f32.xlu1 %v680_v1 }
 0x3db   :  { %v1614_v2 = vpop.eup %1613 }
 0x3dc   :  { %v683_v3 = vsel %vm667_vm1, %v1614_v2, 0.0 }
 0x3dd   :  { %684 = vadd.xlane.f32.xlu1 %v683_v3  ;;  %v1059_v3 = vld [vmem:[%s2094_s10] ss:$0 sm:$0xff] }
 0x466   :  { %v682_v7 = vpop.xlane.xlu1 %681 }
 0x467   :  { %1615 = vrcp.f32 %v682_v7 }
 0x46a   :  { %v685_v8 = vpop.xlane.xlu1 %684 }
 0x46b   :  { %1617 = vrcp.f32 %v685_v8 }
 0x471   :  { %v1616_v11 = vpop.eup %1615 }
 0x472   :  { %v688_v12 = vmul.f32 %v1616_v11, %v1612_v0 }
 0x474   :  { %1329 = vmatmul.mubr.msk.f32.vlgmr.msra.gmra.mrb[6].mxu0 %vm667_vm1, %v688_v12 }
 0x475   :  { %v1618_v16 = vpop.eup %1617  ;;  %1537 = vmatpush3.bf16.msra.mxu0 %v1534_v6 }
 0x476   :  { %v689_v17 = vmul.f32 %v1618_v16, %v1614_v2  ;;  %1539 = vmatprep.subr.bf16.mxu0 %v1538_v13 }
 0x478   :  { %1334 = vmatmul.mubr.msk.f32.vlgmr.msra.gmra.mrb[6].mxu1 %vm667_vm1, %v689_v17 }
 0x479   :  { %1541 = vmatpush3.bf16.msra.mxu0 %v1538_v13  ;;  %1569 = vmatpush3.bf16.msra.mxu1 %v1566_v37 }
 0x47a   :  { %1543 = vmatprep.subr.bf16.mxu0 %v1542_v18  ;;  %1571 = vmatprep.subr.bf16.mxu1 %v1570_v39 }
 0x47d   :  { %1545 = vmatpush3.bf16.msra.mxu0 %v1542_v18  ;;  %1573 = vmatpush3.bf16.msra.mxu1 %v1570_v39 }
 0x47e   :  { %1547 = vmatprep.subr.bf16.mxu0 %v1546_v21  ;;  %1575 = vmatprep.subr.bf16.mxu1 %v1574_v42 }
 0x481   :  { %1549 = vmatpush3.bf16.msra.mxu0 %v1546_v21  ;;  %1577 = vmatpush3.bf16.msra.mxu1 %v1574_v42 }
 0x482   :  { %1551 = vmatprep.subr.bf16.mxu0 %v1550_v24  ;;  %1579 = vmatprep.subr.bf16.mxu1 %v1578_v45 }
 0x485   :  { %1553 = vmatpush3.bf16.msra.mxu0 %v1550_v24  ;;  %1581 = vmatpush3.bf16.msra.mxu1 %v1578_v45 }
 0x486   :  { %1555 = vmatprep.subr.bf16.mxu0 %v1554_v27  ;;  %1583 = vmatprep.subr.bf16.mxu1 %v1582_v48 }
 0x489   :  { %1557 = vmatpush3.bf16.msra.mxu0 %v1554_v27  ;;  %1585 = vmatpush3.bf16.msra.mxu1 %v1582_v48 }
 0x48a   :  { %1559 = vmatprep.subr.bf16.mxu0 %v1558_v30  ;;  %1587 = vmatprep.subr.bf16.mxu1 %v1586_v51 }
 0x48d   :  { %1561 = vmatpush3.bf16.msra.mxu0 %v1558_v30  ;;  %1589 = vmatpush3.bf16.msra.mxu1 %v1586_v51 }
 0x48e   :  { %1563 = vmatprep.subr.bf16.mxu0 %v1562_v33  ;;  %1591 = vmatprep.subr.bf16.mxu1 %v1590_v54 }
 0x491   :  { %1565 = vmatpush3.bf16.msra.mxu0 %v1562_v33  ;;  %1593 = vmatpush3.bf16.msra.mxu1 %v1590_v54 }
 0x492   :  { %1595 = vmatprep.subr.bf16.mxu1 %v1594_v61 }
 0x495   :  { %1597 = vmatpush3.bf16.msra.mxu1 %v1594_v61 }
 0x547   :  { %v759_v55 = vpop.f32.mrb[6].mxu0 }
 0x548   :  { %v1330_v56 = vpop.f32.mrb[7].mxu0  ;;  %1368 = vmatprep.mubr.f32.mxu0 %v759_v55 }
 0x54b   :  { %v832_v57 = vpop.f32.mrb[6].mxu1 }
 0x54c   :  { %v1335_v58 = vpop.f32.mrb[7].mxu1  ;;  %1369 = vmatmul.mubr.f32.vlgmr.msra.gmra.mrb[8].mxu0 %v832_v57 }
 0x61f   :  { %v1370_v63 = vpop.f32.mrb[8].mxu0 }
 0x620   :  { %v925_v0 = vpop.f32.mrb[9].mxu0  ;;  %v931_v2 = vadd.f32 %v1370_v63, %v1058_v62 }
 0x621   :  { %v926_v1 = vadd.f32 %v1058_v62, %v925_v0 }
 0x623   :  { %1403 = vmatprep.mubr.f32.mxu1 %v926_v1 }
 0x624   :  { %1404 = vmatmul.mubr.f32.vlgmr.msra.gmra.mrb[8].mxu1 %v931_v2 }
 0x6f7   :  { %v1405_v4 = vpop.f32.mrb[8].mxu1 }
 0x6f8   :  { %v1029_v5 = vadd.f32 %v1405_v4, %v1059_v3  ;;  %v1023_v6 = vpop.f32.mrb[9].mxu1 }
 0x6f9   :  { %v1024_v7 = vadd.f32 %v1059_v3, %v1023_v6 }
 0x6fa   :  { %1033 = vst [vmem:[#allocation16 + $0x8] sm:$0xff] %v1029_v5 }
 0x6fb   :  { %1032 = vst [vmem:[#allocation16] sm:$0xff] %v1024_v7 }
 0x6fc   :  { %1806 = shalt.err (!%p1803_p12)
}
 0x6fd   :  { %s1807_s10 = scalar_lea.hbm %s2095_s11, 256 }
 0x6fe   :  { %p1808_p13 = scmp.ne.s32.totalorder %s2095_s11, %s1807_s10  ;;  %p1811_p0 = scmp.lt.u32.totalorder %s1807_s10, %s2095_s11 }
 0x700   :  { %p1813_p1 = pnand %p1811_p0, %p1808_p13 }
 0x702   :  { %1816 = shalt.err (!%p1813_p1)
}
 0x703   :  { %1045 = dma.vmem_to_hbm [thread:$0]  %s1040_s19, 256, %s2095_s11, [#allocation4], %s1831_s29, %s1831_s29, %s1832_s30  }
 0x704   :  { %1827 = dma.done.wait [#allocation4], 256  }
 0x705   :  { %1828 = vsyncadd [#allocation4], 4294967040 }
 0x706   :  { %1049 = vsyncpa [#allocation3], 1 }
 0x707   :  { %1050 = vsyncpa [#allocation6], 1 }
 0x708   :  { %1051 = vsyncpa [#allocation9], 1 }
 0x709   :  { %1052 = vsyncpa [#allocation12], 1 }
 0x70a   :  { %1053 = vsyncpa [#allocation15], 1 }
 0x70b   :  { %1054 = vsyncpa [#allocation4], 1 }

</bundles_post_ra>
